<compile_context>
chip_gen: v7x
topology: tpu7x:2x2x1
jax: 0.10.0
libtpu: 0.0.40
codegen_flags: <defaults>
</compile_context>

<pallas_src>
import functools

import jax
import jax.numpy as jnp
from jax import lax
from jax.experimental import pallas as pl
from jax.experimental.pallas import tpu as pltpu


def _round_up(x, m):
    return (x + m - 1) // m * m


def _largest_divisor_leq(n, target):
    """Largest divisor of n that is <= target (>= 1)."""
    t = max(1, min(int(target), int(n)))
    while n % t:
        t -= 1
    return t


def _vmem_limit_bytes(estimate):
    """Scoped-VMEM request from actual block/scratch sizes + headroom, clamped
    well inside the smallest physical VMEM across chips (v7x: 64 MiB)."""
    return int(min(max(estimate + (4 << 20), 16 << 20), 56 << 20))


# ----------------------------------------------------------------------------
# Kernel 1: GRU recurrence over a chunk of T timesteps + final dense (H -> E)
#   grid = (batch_blocks, num_chunks), semantics ("parallel", "arbitrary")
# ----------------------------------------------------------------------------
def _gru_recurrence_kernel(x_ref,      # (T*Bb, Ep)  bf16 time-major chunk of embeddings
                           wih_ref,    # (Ep, 3*Hp)  bf16 (gate blocks 128-aligned)
                           whh_ref,    # (Hp, 3*Hp)  bf16
                           wd_ref,     # (Hp, Ep)    bf16 dense.weight.T
                           bd_ref,     # (1, Ep)     f32  dense.bias
                           feats_ref,  # (Bb, Ep)    bf16 output features
                           h_scr,      # (Bb, Hp)    f32  hidden-state scratch
                           gx_scr):    # (T*Bb, 3Hp) f32  hoisted input projection
    Bb, Hp = h_scr.shape
    T = x_ref.shape[0] // Bb
    c = pl.program_id(1)

    @pl.when(c == 0)
    def _():
        h_scr[...] = jnp.zeros(h_scr.shape, h_scr.dtype)

    # Hoisted input projection for the whole chunk: one MXU-friendly matmul
    # instead of T tiny (Bb, E) x (E, 3H) dots on the serial critical path.
    gx_scr[...] = jnp.dot(x_ref[...], wih_ref[...],
                          preferred_element_type=jnp.float32)        # (T*Bb, 3Hp) f32

    whh = whh_ref[...]                                               # (Hp, 3Hp) bf16
    # TODO(synk): hold W_hh in MXU staging across the chunk via
    #             pltpu.matmul_push_rhs / matmul_acc_lhs so the weight is not
    #             re-pushed every timestep at small batch.

    def step(t, h):
        # h carried in vregs; gx pulled from the per-chunk VMEM staging buffer
        # with an aligned dynamic slice (keeps the unroll bounded at large T).
        off = pl.multiple_of(t * Bb, Bb)
        gx = gx_scr[pl.ds(off, Bb), :]                               # (Bb, 3Hp) f32
        # NOTE: h is cast to bf16 for the MXU; f32 accumulation. Re-validate
        # drift at production sequence lengths (keep weights-only bf16 if so).
        gh = jnp.dot(h.astype(jnp.bfloat16), whh,
                     preferred_element_type=jnp.float32)             # (Bb, 3Hp) f32
        r = jax.nn.sigmoid(gx[:, 0:Hp] + gh[:, 0:Hp])
        z = jax.nn.sigmoid(gx[:, Hp:2 * Hp] + gh[:, Hp:2 * Hp])
        n = jnp.tanh(gx[:, 2 * Hp:3 * Hp] + r * gh[:, 2 * Hp:3 * Hp])
        return (1.0 - z) * n + z * h

    # Bounded unroll: LLO scheduling visibility without code-size / vreg blowup.
    h = lax.fori_loop(0, T, step, h_scr[...], unroll=min(T, 8))
    h_scr[...] = h                                                   # one spill per chunk

    @pl.when(c == pl.num_programs(1) - 1)
    def _():
        feats = jnp.dot(h.astype(jnp.bfloat16), wd_ref[...],
                        preferred_element_type=jnp.float32) + bd_ref[...]
        feats_ref[...] = feats.astype(feats_ref.dtype)               # bf16 out


# ----------------------------------------------------------------------------
# Kernel 2: output projection (E -> num_item+1), tiled over the item axis
# ----------------------------------------------------------------------------
def _output_proj_kernel(feats_ref,   # (B, Ep)       bf16
                        wo_ref,      # (Ep, TILE_N)  bf16
                        bo_ref,      # (1, TILE_N)   f32
                        out_ref):    # (B, TILE_N)   f32
    out_ref[...] = jnp.dot(feats_ref[...], wo_ref[...],
                           preferred_element_type=jnp.float32) + bo_ref[...]


# ----------------------------------------------------------------------------
# One-time parameter preparation (hoisted out of the per-call path)
# ----------------------------------------------------------------------------
def prepare_params(params, *, tile_n=2048):
    """Pad / reorder / cast weights once at load time. Returns device arrays."""
    emb = params["emb"]                               # (num_item+1, E) f32
    num_classes, E = emb.shape
    H = params["w_hh"].shape[1]

    Ep = _round_up(E, 128)
    Hp = _round_up(H, 128)
    TILE_N = min(tile_n, _round_up(num_classes, 128))
    Np = _round_up(num_classes, TILE_N)

    def pad_gates(w, in_dim, in_pad):
        # PyTorch (3H, in), gate order [r, z, n] -> (in_pad, 3*Hp), each gate
        # block padded to Hp so gate slices land on 128-lane boundaries.
        w3 = w.reshape(3, H, in_dim)
        w3 = jnp.pad(w3, ((0, 0), (0, Hp - H), (0, in_pad - in_dim)))
        return jnp.transpose(w3, (2, 0, 1)).reshape(in_pad, 3 * Hp).astype(jnp.bfloat16)

    return {
        "emb": jnp.pad(emb, ((0, 0), (0, Ep - E))).astype(jnp.bfloat16),   # (N, Ep)
        "wih": pad_gates(params["w_ih"], E, Ep),                           # (Ep, 3Hp)
        "whh": pad_gates(params["w_hh"], H, Hp),                           # (Hp, 3Hp)
        "wd": jnp.pad(params["wd"].T, ((0, Hp - H), (0, Ep - E))).astype(jnp.bfloat16),
        "bd": jnp.pad(params["bd"], (0, Ep - E)).reshape(1, Ep).astype(jnp.float32),
        "wo": jnp.pad(params["wo"].T,
                      ((0, Ep - E), (0, Np - num_classes))).astype(jnp.bfloat16),
        "bo": jnp.pad(params["bo"], (0, Np - num_classes)).reshape(1, Np).astype(jnp.float32),
    }


# ----------------------------------------------------------------------------
# Forward pass: gather glue + two pallas_calls
# ----------------------------------------------------------------------------
def gru4rec_forward(item_ids, prepared, *, time_chunk=16, tile_n=2048, batch_blocks=1):
    """item_ids: (B, S) int32 ids. `prepared` from prepare_params (same tile_n).
    batch_blocks: set to 2 on multi-TensorCore chips (v7x) when B//2 >= 8.
    Returns logits (B, num_item+1) in f32."""
    emb, wih, whh = prepared["emb"], prepared["wih"], prepared["whh"]
    wd, bd, wo, bo = prepared["wd"], prepared["bd"], prepared["wo"], prepared["bo"]

    B, S = item_ids.shape
    num_classes, Ep = emb.shape
    Hp = whh.shape[0]
    Np = wo.shape[1]
    TILE_N = min(tile_n, Np)
    assert Np % TILE_N == 0, "tile_n must match the value used in prepare_params"

    nb = batch_blocks
    assert B % nb == 0 and (B // nb) % 8 == 0, \
        "batch_blocks must divide B and leave a multiple of 8 rows per block"
    Bb = B // nb

    # Largest divisor of S <= time_chunk (never collapses to one huge chunk).
    T = _largest_divisor_leq(S, time_chunk)
    num_chunks = S // T

    # --- glue: rearrange the (tiny) int ids, then one bf16 gather ------------
    # x[c, b, t*Bb + i, :] = emb[item_ids[b*Bb + i, c*T + t]]
    # TODO(synk): move the gather into kernel 1 (scalar-prefetched ids + row
    #             DMA) so (S, B, Ep) never materializes in HBM at all.
    ids_r = jnp.transpose(item_ids.reshape(nb, Bb, num_chunks, T), (2, 0, 3, 1))
    ids_r = ids_r.reshape(num_chunks, nb, T * Bb)
    x = emb[ids_r]                                   # (num_chunks, nb, T*Bb, Ep) bf16
    # Dropout(emb): identity in eval mode.

    # --- kernel 1: recurrence + dense; x streamed over time chunks ----------
    k1_est = (2 * T * Bb * Ep * 2          # x chunk (bf16), double-buffered
              + 2 * Ep * 3 * Hp * 2        # wih
              + 2 * Hp * 3 * Hp * 2        # whh
              + 2 * Hp * Ep * 2            # wd
              + 2 * Ep * 4                 # bd
              + 2 * Bb * Ep * 2            # feats out (bf16)
              + Bb * Hp * 4                # h scratch
              + T * Bb * 3 * Hp * 4)       # gx scratch
    # TODO(synk): for large E/H set pipeline_mode=pl.Buffered(1) on the
    #             constant-index weight BlockSpecs to halve their VMEM footprint.
    feats = pl.pallas_call(
        _gru_recurrence_kernel,
        out_shape=jax.ShapeDtypeStruct((B, Ep), jnp.bfloat16),
        grid_spec=pltpu.PrefetchScalarGridSpec(
            num_scalar_prefetch=0,
            grid=(nb, num_chunks),
            in_specs=[
                pl.BlockSpec((None, None, T * Bb, Ep), lambda b, c: (c, b, 0, 0)),  # x
                pl.BlockSpec((Ep, 3 * Hp), lambda b, c: (0, 0)),                    # W_ih^T
                pl.BlockSpec((Hp, 3 * Hp), lambda b, c: (0, 0)),                    # W_hh^T
                pl.BlockSpec((Hp, Ep), lambda b, c: (0, 0)),                        # dense W^T
                pl.BlockSpec((1, Ep), lambda b, c: (0, 0)),                         # dense b
            ],
            out_specs=pl.BlockSpec((Bb, Ep), lambda b, c: (b, 0)),
            scratch_shapes=[pltpu.VMEM((Bb, Hp), jnp.float32),
                            pltpu.VMEM((T * Bb, 3 * Hp), jnp.float32)],
        ),
        compiler_params=pltpu.CompilerParams(
            dimension_semantics=("parallel", "arbitrary"),
            vmem_limit_bytes=_vmem_limit_bytes(k1_est)),
    )(x, wih, whh, wd, bd)

    # --- kernel 2: output projection, tiled / parallel over the item axis ---
    k2_est = (2 * B * Ep * 2 + 2 * Ep * TILE_N * 2
              + 2 * TILE_N * 4 + 2 * B * TILE_N * 4)
    logits = pl.pallas_call(
        _output_proj_kernel,
        out_shape=jax.ShapeDtypeStruct((B, Np), jnp.float32),
        grid_spec=pltpu.PrefetchScalarGridSpec(
            num_scalar_prefetch=0,
            grid=(Np // TILE_N,),
            in_specs=[
                pl.BlockSpec((B, Ep), lambda j: (0, 0)),             # feats (bf16)
                pl.BlockSpec((Ep, TILE_N), lambda j: (0, j)),        # W_out^T tile
                pl.BlockSpec((1, TILE_N), lambda j: (0, j)),         # b_out tile
            ],
            out_specs=pl.BlockSpec((B, TILE_N), lambda j: (0, j)),
        ),
        compiler_params=pltpu.CompilerParams(
            dimension_semantics=("parallel",),
            vmem_limit_bytes=_vmem_limit_bytes(k2_est)),
    )(feats, wo, bo)

    return logits[:, :num_classes]


# ----------------------------------------------------------------------------
# Pure-JAX (f32) reference for verification
# ----------------------------------------------------------------------------
def gru4rec_ref(item_ids, params):
    emb = params["emb"][item_ids]                   # (B, S, E)
    B, S, E = emb.shape
    H = params["w_hh"].shape[1]
    w_ih_t = params["w_ih"].T
    w_hh_t = params["w_hh"].T

    def cell(h, x_t):
        gx = x_t @ w_ih_t
        gh = h @ w_hh_t
        r = jax.nn.sigmoid(gx[:, :H] + gh[:, :H])
        z = jax.nn.sigmoid(gx[:, H:2 * H] + gh[:, H:2 * H])
        n = jnp.tanh(gx[:, 2 * H:] + r * gh[:, 2 * H:])
        return (1.0 - z) * n + z * h, None

    h0 = jnp.zeros((B, H), jnp.float32)
    h_last, _ = lax.scan(cell, h0, jnp.transpose(emb, (1, 0, 2)))
    feats = h_last @ params["wd"].T + params["bd"]
    return feats @ params["wo"].T + params["bo"]


# ----------------------------------------------------------------------------
# Deterministic parameter construction (matches module shapes / init style)
# ----------------------------------------------------------------------------
def make_params(key, num_item, E, H):
    N = num_item + 1
    k = jax.random.split(key, 8)

    # Embedding: xavier_normal_, padding_idx=0 row zeroed.
    std_emb = (2.0 / (N + E)) ** 0.5
    emb = std_emb * jax.random.normal(k[0], (N, E), jnp.float32)
    emb = emb.at[0].set(0.0)

    # GRU weights (bias=False): xavier_uniform_, gate order [r, z, n].
    b_ih = (6.0 / (3 * H + E)) ** 0.5
    w_ih = jax.random.uniform(k[1], (3 * H, E), jnp.float32, -b_ih, b_ih)
    b_hh = (6.0 / (3 * H + H)) ** 0.5
    w_hh = jax.random.uniform(k[2], (3 * H, H), jnp.float32, -b_hh, b_hh)

    # dense: Linear(H, E); output: Linear(E, N)  (PyTorch default-style uniform)
    kd = 1.0 / (H ** 0.5)
    wd = jax.random.uniform(k[3], (E, H), jnp.float32, -kd, kd)
    bd = jax.random.uniform(k[4], (E,), jnp.float32, -kd, kd)
    ko = 1.0 / (E ** 0.5)
    wo = jax.random.uniform(k[5], (N, E), jnp.float32, -ko, ko)
    bo = jax.random.uniform(k[6], (N,), jnp.float32, -ko, ko)

    return {"emb": emb, "w_ih": w_ih, "w_hh": w_hh,
            "wd": wd, "bd": bd, "wo": wo, "bo": bo}


if __name__ == "__main__":
    # Small shapes: batch=16, seq=8, d_model=32, hidden=32, num_item=63 -> 64 logits.
    # time_chunk=4 / batch_blocks=2 are deliberately small here to exercise the
    # multi-chunk carry and the parallel batch-block path at tiny sizes; real
    # deployments should use the defaults (time_chunk=16, tile_n>=2048).
    B, S, E, H, NUM_ITEM = 16, 8, 32, 32, 63

    key = jax.random.PRNGKey(0)
    pkey, xkey = jax.random.split(key)
    params = make_params(pkey, NUM_ITEM, E, H)
    item_ids = jax.random.randint(xkey, (B, S), 0, NUM_ITEM + 1, jnp.int32)

    # One-time weight layout prep (hoisted out of the per-call path).
    prepared = prepare_params(params, tile_n=2048)

    fwd = jax.jit(functools.partial(gru4rec_forward,
                                    time_chunk=4, tile_n=2048, batch_blocks=2))
    logits = fwd(item_ids, prepared)
    logits = jax.block_until_ready(logits)

    ref = gru4rec_ref(item_ids, params)
    assert logits.shape == (B, NUM_ITEM + 1)
    # bf16 MXU inputs (f32 accumulation) vs pure-f32 reference -> loose-ish tol.
    assert jnp.allclose(logits, ref, rtol=2e-2, atol=2e-2), "mismatch vs reference"

    print("KERNEL_OK")
</pallas_src>

<mosaic_0001>
module attributes {stable_mosaic.version = 11 : i64} {
  func.func @_output_proj_kernel(%arg0: i32, %arg1: memref<16x128xbf16, #tpu.memory_space<vmem>>, %arg2: memref<128x128xbf16, #tpu.memory_space<vmem>>, %arg3: memref<1x128xf32, #tpu.memory_space<vmem>>, %arg4: memref<16x128xf32, #tpu.memory_space<vmem>>) attributes {dimension_semantics = [#tpu.dimension_semantics<parallel>], iteration_bounds = array<i64: 1>, scalar_prefetch = 0 : i64, scratch_operands = 0 : i64, tpu.core_type = #tpu.core_type<tc>, window_params = [{pipeline_mode = #tpu.pipeline_mode<synchronous>, transform_indices = @transform_0, window_bounds = array<i64: 16, 128>}, {transform_indices = @transform_1, window_bounds = array<i64: 128, 128>}, {transform_indices = @transform_2, window_bounds = array<i64: 1, 128>}, {transform_indices = @transform_3, window_bounds = array<i64: 16, 128>}]} {
    %c0 = arith.constant 0 : index
    %c0_0 = arith.constant 0 : index
    %0 = vector.load %arg1[%c0, %c0_0] : memref<16x128xbf16, #tpu.memory_space<vmem>>, vector<16x128xbf16>
    %c0_1 = arith.constant 0 : index
    %c0_2 = arith.constant 0 : index
    %1 = vector.load %arg2[%c0_1, %c0_2] : memref<128x128xbf16, #tpu.memory_space<vmem>>, vector<128x128xbf16>
    %cst = arith.constant dense<0.000000e+00> : vector<16x128xf32>
    %2 = tpu.matmul %0, %1, %cst {dimension_numbers = #tpu.dot_dimension_numbers<[1], [0], [0], [1], [0, 0, 1, 1], [], []>} : vector<16x128xbf16>, vector<128x128xbf16>, vector<16x128xf32> -> vector<16x128xf32>
    %c0_3 = arith.constant 0 : index
    %c0_4 = arith.constant 0 : index
    %3 = vector.load %arg3[%c0_3, %c0_4] : memref<1x128xf32, #tpu.memory_space<vmem>>, vector<1x128xf32>
    %4 = vector.broadcast %3 : vector<1x128xf32> to vector<16x128xf32>
    %5 = arith.addf %2, %4 : vector<16x128xf32>
    %c0_5 = arith.constant 0 : index
    %c0_6 = arith.constant 0 : index
    %6 = vector.load %arg4[%c0_5, %c0_6] : memref<16x128xf32, #tpu.memory_space<vmem>>, vector<16x128xf32>
    tpu.vector_store %arg4[%c0_5, %c0_6], %5 {strides = array<i32>} : memref<16x128xf32, #tpu.memory_space<vmem>>, vector<16x128xf32>,
    return
  }
  func.func @transform_0(%arg0: i32) -> (i32, i32) {
    %c0_i32 = arith.constant 0 : i32
    %c0_i32_0 = arith.constant 0 : i32
    %c0_i32_1 = arith.constant 0 : i32
    return %c0_i32, %c0_i32_0 : i32, i32
  }
  func.func @transform_1(%arg0: i32) -> (i32, i32) {
    %c0_i32 = arith.constant 0 : i32
    %c0_i32_0 = arith.constant 0 : i32
    return %c0_i32, %arg0 : i32, i32
  }
  func.func @transform_2(%arg0: i32) -> (i32, i32) {
    %c0_i32 = arith.constant 0 : i32
    %c0_i32_0 = arith.constant 0 : i32
    return %c0_i32, %arg0 : i32, i32
  }
  func.func @transform_3(%arg0: i32) -> (i32, i32) {
    %c0_i32 = arith.constant 0 : i32
    %c0_i32_0 = arith.constant 0 : i32
    return %c0_i32, %arg0 : i32, i32
  }
}

module attributes {stable_mosaic.version = 11 : i64} {
  func.func @_gru_recurrence_kernel(%arg0: i32, %arg1: i32, %arg2: memref<1x1x32x128xbf16, #tpu.memory_space<vmem>>, %arg3: memref<128x384xbf16, #tpu.memory_space<vmem>>, %arg4: memref<128x384xbf16, #tpu.memory_space<vmem>>, %arg5: memref<128x128xbf16, #tpu.memory_space<vmem>>, %arg6: memref<1x128xf32, #tpu.memory_space<vmem>>, %arg7: memref<8x128xbf16, #tpu.memory_space<vmem>>, %arg8: memref<8x128xf32, #tpu.memory_space<vmem>>, %arg9: memref<32x384xf32, #tpu.memory_space<vmem>>) attributes {dimension_semantics = [#tpu.dimension_semantics<parallel>, #tpu.dimension_semantics<arbitrary>], iteration_bounds = array<i64: 2, 2>, scalar_prefetch = 0 : i64, scratch_operands = 2 : i64, tpu.core_type = #tpu.core_type<tc>, window_params = [{transform_indices = @transform_0, window_bounds = array<i64: 1, 1, 32, 128>}, {pipeline_mode = #tpu.pipeline_mode<synchronous>, transform_indices = @transform_1, window_bounds = array<i64: 128, 384>}, {pipeline_mode = #tpu.pipeline_mode<synchronous>, transform_indices = @transform_2, window_bounds = array<i64: 128, 384>}, {pipeline_mode = #tpu.pipeline_mode<synchronous>, transform_indices = @transform_3, window_bounds = array<i64: 128, 128>}, {pipeline_mode = #tpu.pipeline_mode<synchronous>, transform_indices = @transform_4, window_bounds = array<i64: 1, 128>}, {transform_indices = @transform_5, window_bounds = array<i64: 8, 128>}]} {
    %c0_i32 = arith.constant 0 : i32
    %0 = arith.cmpi eq, %arg1, %c0_i32 : i32
    %1 = arith.extui %0 : i1 to i32
    %c0_i32_0 = arith.constant 0 : i32
    %2 = arith.cmpi ne, %1, %c0_i32_0 : i32
    scf.if %2 {
      %cst_40 = arith.constant 0.000000e+00 : f32
      %142 = vector.broadcast %cst_40 : f32 to vector<8x128xf32>
      %c0_41 = arith.constant 0 : index
      %c0_42 = arith.constant 0 : index
      %143 = vector.load %arg8[%c0_41, %c0_42] : memref<8x128xf32, #tpu.memory_space<vmem>>, vector<8x128xf32>
      tpu.vector_store %arg8[%c0_41, %c0_42], %142 {strides = array<i32>} : memref<8x128xf32, #tpu.memory_space<vmem>>, vector<8x128xf32>,
    } else {
    }
    %c0 = arith.constant 0 : index
    %c0_1 = arith.constant 0 : index
    %c0_2 = arith.constant 0 : index
    %c0_3 = arith.constant 0 : index
    %3 = vector.load %arg2[%c0, %c0_1, %c0_2, %c0_3] : memref<1x1x32x128xbf16, #tpu.memory_space<vmem>>, vector<1x1x32x128xbf16>
    %4 = vector.shape_cast %3 : vector<1x1x32x128xbf16> to vector<32x128xbf16>
    %c0_4 = arith.constant 0 : index
    %c0_5 = arith.constant 0 : index
    %5 = vector.load %arg3[%c0_4, %c0_5] : memref<128x384xbf16, #tpu.memory_space<vmem>>, vector<128x384xbf16>
    %cst = arith.constant dense<0.000000e+00> : vector<32x384xf32>
    %6 = tpu.matmul %4, %5, %cst {dimension_numbers = #tpu.dot_dimension_numbers<[1], [0], [0], [1], [0, 0, 1, 1], [], []>} : vector<32x128xbf16>, vector<128x384xbf16>, vector<32x384xf32> -> vector<32x384xf32>
    %c0_6 = arith.constant 0 : index
    %c0_7 = arith.constant 0 : index
    %7 = vector.load %arg9[%c0_6, %c0_7] : memref<32x384xf32, #tpu.memory_space<vmem>>, vector<32x384xf32>
    tpu.vector_store %arg9[%c0_6, %c0_7], %6 {strides = array<i32>} : memref<32x384xf32, #tpu.memory_space<vmem>>, vector<32x384xf32>,
    %c0_8 = arith.constant 0 : index
    %c0_9 = arith.constant 0 : index
    %8 = vector.load %arg4[%c0_8, %c0_9] : memref<128x384xbf16, #tpu.memory_space<vmem>>, vector<128x384xbf16>
    %c0_10 = arith.constant 0 : index
    %c0_11 = arith.constant 0 : index
    %9 = vector.load %arg8[%c0_10, %c0_11] : memref<8x128xf32, #tpu.memory_space<vmem>>, vector<8x128xf32>
    %c0_i32_12 = arith.constant 0 : i32
    %c8_i32 = arith.constant 8 : i32
    %10 = arith.muli %c0_i32_12, %c8_i32 : i32
    %11 = tpu.assume_multiple %10, 8 : i32
    %12 = arith.index_cast %11 : i32 to index
    %c0_13 = arith.constant 0 : index
    %13 = vector.load %arg9[%12, %c0_13] : memref<32x384xf32, #tpu.memory_space<vmem>>, vector<8x384xf32>
    %14 = arith.truncf %9 : vector<8x128xf32> to vector<8x128xbf16>
    %cst_14 = arith.constant dense<0.000000e+00> : vector<8x384xf32>
    %15 = tpu.matmul %14, %8, %cst_14 {dimension_numbers = #tpu.dot_dimension_numbers<[1], [0], [0], [1], [0, 0, 1, 1], [], []>} : vector<8x128xbf16>, vector<128x384xbf16>, vector<8x384xf32> -> vector<8x384xf32>
    %16 = vector.extract_strided_slice %13 {offsets = [0, 0], sizes = [8, 128], strides = [1, 1]} : vector<8x384xf32> to vector<8x128xf32>
    %17 = vector.extract_strided_slice %15 {offsets = [0, 0], sizes = [8, 128], strides = [1, 1]} : vector<8x384xf32> to vector<8x128xf32>
    %18 = arith.addf %16, %17 : vector<8x128xf32>
    %19 = arith.negf %18 : vector<8x128xf32>
    %20 = math.exp %19 : vector<8x128xf32>
    %cst_15 = arith.constant 1.000000e+00 : f32
    %21 = vector.broadcast %cst_15 : f32 to vector<8x128xf32>
    %22 = arith.addf %21, %20 : vector<8x128xf32>
    %23 = arith.divf %21, %22 : vector<8x128xf32>
    %24 = vector.extract_strided_slice %13 {offsets = [0, 128], sizes = [8, 128], strides = [1, 1]} : vector<8x384xf32> to vector<8x128xf32>
    %25 = vector.extract_strided_slice %15 {offsets = [0, 128], sizes = [8, 128], strides = [1, 1]} : vector<8x384xf32> to vector<8x128xf32>
    %26 = arith.addf %24, %25 : vector<8x128xf32>
    %27 = arith.negf %26 : vector<8x128xf32>
    %28 = math.exp %27 : vector<8x128xf32>
    %cst_16 = arith.constant 1.000000e+00 : f32
    %29 = vector.broadcast %cst_16 : f32 to vector<8x128xf32>
    %30 = arith.addf %29, %28 : vector<8x128xf32>
    %31 = arith.divf %29, %30 : vector<8x128xf32>
    %32 = vector.extract_strided_slice %13 {offsets = [0, 256], sizes = [8, 128], strides = [1, 1]} : vector<8x384xf32> to vector<8x128xf32>
    %33 = vector.extract_strided_slice %15 {offsets = [0, 256], sizes = [8, 128], strides = [1, 1]} : vector<8x384xf32> to vector<8x128xf32>
    %34 = arith.mulf %23, %33 : vector<8x128xf32>
    %35 = arith.addf %32, %34 : vector<8x128xf32>
    %36 = math.tanh %35 : vector<8x128xf32>
    %cst_17 = arith.constant 1.000000e+00 : f32
    %37 = vector.broadcast %cst_17 : f32 to vector<8x128xf32>
    %38 = arith.subf %37, %31 : vector<8x128xf32>
    %39 = arith.mulf %38, %36 : vector<8x128xf32>
    %40 = arith.mulf %31, %9 : vector<8x128xf32>
    %41 = arith.addf %39, %40 : vector<8x128xf32>
    %c1_i32 = arith.constant 1 : i32
    %c8_i32_18 = arith.constant 8 : i32
    %42 = arith.muli %c1_i32, %c8_i32_18 : i32
    %43 = tpu.assume_multiple %42, 8 : i32
    %44 = arith.index_cast %43 : i32 to index
    %c0_19 = arith.constant 0 : index
    %45 = vector.load %arg9[%44, %c0_19] : memref<32x384xf32, #tpu.memory_space<vmem>>, vector<8x384xf32>
    %46 = arith.truncf %41 : vector<8x128xf32> to vector<8x128xbf16>
    %cst_20 = arith.constant dense<0.000000e+00> : vector<8x384xf32>
    %47 = tpu.matmul %46, %8, %cst_20 {dimension_numbers = #tpu.dot_dimension_numbers<[1], [0], [0], [1], [0, 0, 1, 1], [], []>} : vector<8x128xbf16>, vector<128x384xbf16>, vector<8x384xf32> -> vector<8x384xf32>
    %48 = vector.extract_strided_slice %45 {offsets = [0, 0], sizes = [8, 128], strides = [1, 1]} : vector<8x384xf32> to vector<8x128xf32>
    %49 = vector.extract_strided_slice %47 {offsets = [0, 0], sizes = [8, 128], strides = [1, 1]} : vector<8x384xf32> to vector<8x128xf32>
    %50 = arith.addf %48, %49 : vector<8x128xf32>
    %51 = arith.negf %50 : vector<8x128xf32>
    %52 = math.exp %51 : vector<8x128xf32>
    %cst_21 = arith.constant 1.000000e+00 : f32
    %53 = vector.broadcast %cst_21 : f32 to vector<8x128xf32>
    %54 = arith.addf %53, %52 : vector<8x128xf32>
    %55 = arith.divf %53, %54 : vector<8x128xf32>
    %56 = vector.extract_strided_slice %45 {offsets = [0, 128], sizes = [8, 128], strides = [1, 1]} : vector<8x384xf32> to vector<8x128xf32>
    %57 = vector.extract_strided_slice %47 {offsets = [0, 128], sizes = [8, 128], strides = [1, 1]} : vector<8x384xf32> to vector<8x128xf32>
    %58 = arith.addf %56, %57 : vector<8x128xf32>
    %59 = arith.negf %58 : vector<8x128xf32>
    %60 = math.exp %59 : vector<8x128xf32>
    %cst_22 = arith.constant 1.000000e+00 : f32
    %61 = vector.broadcast %cst_22 : f32 to vector<8x128xf32>
    %62 = arith.addf %61, %60 : vector<8x128xf32>
    %63 = arith.divf %61, %62 : vector<8x128xf32>
    %64 = vector.extract_strided_slice %45 {offsets = [0, 256], sizes = [8, 128], strides = [1, 1]} : vector<8x384xf32> to vector<8x128xf32>
    %65 = vector.extract_strided_slice %47 {offsets = [0, 256], sizes = [8, 128], strides = [1, 1]} : vector<8x384xf32> to vector<8x128xf32>
    %66 = arith.mulf %55, %65 : vector<8x128xf32>
    %67 = arith.addf %64, %66 : vector<8x128xf32>
    %68 = math.tanh %67 : vector<8x128xf32>
    %cst_23 = arith.constant 1.000000e+00 : f32
    %69 = vector.broadcast %cst_23 : f32 to vector<8x128xf32>
    %70 = arith.subf %69, %63 : vector<8x128xf32>
    %71 = arith.mulf %70, %68 : vector<8x128xf32>
    %72 = arith.mulf %63, %41 : vector<8x128xf32>
    %73 = arith.addf %71, %72 : vector<8x128xf32>
    %c2_i32 = arith.constant 2 : i32
    %c8_i32_24 = arith.constant 8 : i32
    %74 = arith.muli %c2_i32, %c8_i32_24 : i32
    %75 = tpu.assume_multiple %74, 8 : i32
    %76 = arith.index_cast %75 : i32 to index
    %c0_25 = arith.constant 0 : index
    %77 = vector.load %arg9[%76, %c0_25] : memref<32x384xf32, #tpu.memory_space<vmem>>, vector<8x384xf32>
    %78 = arith.truncf %73 : vector<8x128xf32> to vector<8x128xbf16>
    %cst_26 = arith.constant dense<0.000000e+00> : vector<8x384xf32>
    %79 = tpu.matmul %78, %8, %cst_26 {dimension_numbers = #tpu.dot_dimension_numbers<[1], [0], [0], [1], [0, 0, 1, 1], [], []>} : vector<8x128xbf16>, vector<128x384xbf16>, vector<8x384xf32> -> vector<8x384xf32>
    %80 = vector.extract_strided_slice %77 {offsets = [0, 0], sizes = [8, 128], strides = [1, 1]} : vector<8x384xf32> to vector<8x128xf32>
    %81 = vector.extract_strided_slice %79 {offsets = [0, 0], sizes = [8, 128], strides = [1, 1]} : vector<8x384xf32> to vector<8x128xf32>
    %82 = arith.addf %80, %81 : vector<8x128xf32>
    %83 = arith.negf %82 : vector<8x128xf32>
    %84 = math.exp %83 : vector<8x128xf32>
    %cst_27 = arith.constant 1.000000e+00 : f32
    %85 = vector.broadcast %cst_27 : f32 to vector<8x128xf32>
    %86 = arith.addf %85, %84 : vector<8x128xf32>
    %87 = arith.divf %85, %86 : vector<8x128xf32>
    %88 = vector.extract_strided_slice %77 {offsets = [0, 128], sizes = [8, 128], strides = [1, 1]} : vector<8x384xf32> to vector<8x128xf32>
    %89 = vector.extract_strided_slice %79 {offsets = [0, 128], sizes = [8, 128], strides = [1, 1]} : vector<8x384xf32> to vector<8x128xf32>
    %90 = arith.addf %88, %89 : vector<8x128xf32>
    %91 = arith.negf %90 : vector<8x128xf32>
    %92 = math.exp %91 : vector<8x128xf32>
    %cst_28 = arith.constant 1.000000e+00 : f32
    %93 = vector.broadcast %cst_28 : f32 to vector<8x128xf32>
    %94 = arith.addf %93, %92 : vector<8x128xf32>
    %95 = arith.divf %93, %94 : vector<8x128xf32>
    %96 = vector.extract_strided_slice %77 {offsets = [0, 256], sizes = [8, 128], strides = [1, 1]} : vector<8x384xf32> to vector<8x128xf32>
    %97 = vector.extract_strided_slice %79 {offsets = [0, 256], sizes = [8, 128], strides = [1, 1]} : vector<8x384xf32> to vector<8x128xf32>
    %98 = arith.mulf %87, %97 : vector<8x128xf32>
    %99 = arith.addf %96, %98 : vector<8x128xf32>
    %100 = math.tanh %99 : vector<8x128xf32>
    %cst_29 = arith.constant 1.000000e+00 : f32
    %101 = vector.broadcast %cst_29 : f32 to vector<8x128xf32>
    %102 = arith.subf %101, %95 : vector<8x128xf32>
    %103 = arith.mulf %102, %100 : vector<8x128xf32>
    %104 = arith.mulf %95, %73 : vector<8x128xf32>
    %105 = arith.addf %103, %104 : vector<8x128xf32>
    %c3_i32 = arith.constant 3 : i32
    %c8_i32_30 = arith.constant 8 : i32
    %106 = arith.muli %c3_i32, %c8_i32_30 : i32
    %107 = tpu.assume_multiple %106, 8 : i32
    %108 = arith.index_cast %107 : i32 to index
    %c0_31 = arith.constant 0 : index
    %109 = vector.load %arg9[%108, %c0_31] : memref<32x384xf32, #tpu.memory_space<vmem>>, vector<8x384xf32>
    %110 = arith.truncf %105 : vector<8x128xf32> to vector<8x128xbf16>
    %cst_32 = arith.constant dense<0.000000e+00> : vector<8x384xf32>
    %111 = tpu.matmul %110, %8, %cst_32 {dimension_numbers = #tpu.dot_dimension_numbers<[1], [0], [0], [1], [0, 0, 1, 1], [], []>} : vector<8x128xbf16>, vector<128x384xbf16>, vector<8x384xf32> -> vector<8x384xf32>
    %112 = vector.extract_strided_slice %109 {offsets = [0, 0], sizes = [8, 128], strides = [1, 1]} : vector<8x384xf32> to vector<8x128xf32>
    %113 = vector.extract_strided_slice %111 {offsets = [0, 0], sizes = [8, 128], strides = [1, 1]} : vector<8x384xf32> to vector<8x128xf32>
    %114 = arith.addf %112, %113 : vector<8x128xf32>
    %115 = arith.negf %114 : vector<8x128xf32>
    %116 = math.exp %115 : vector<8x128xf32>
    %cst_33 = arith.constant 1.000000e+00 : f32
    %117 = vector.broadcast %cst_33 : f32 to vector<8x128xf32>
    %118 = arith.addf %117, %116 : vector<8x128xf32>
    %119 = arith.divf %117, %118 : vector<8x128xf32>
    %120 = vector.extract_strided_slice %109 {offsets = [0, 128], sizes = [8, 128], strides = [1, 1]} : vector<8x384xf32> to vector<8x128xf32>
    %121 = vector.extract_strided_slice %111 {offsets = [0, 128], sizes = [8, 128], strides = [1, 1]} : vector<8x384xf32> to vector<8x128xf32>
    %122 = arith.addf %120, %121 : vector<8x128xf32>
    %123 = arith.negf %122 : vector<8x128xf32>
    %124 = math.exp %123 : vector<8x128xf32>
    %cst_34 = arith.constant 1.000000e+00 : f32
    %125 = vector.broadcast %cst_34 : f32 to vector<8x128xf32>
    %126 = arith.addf %125, %124 : vector<8x128xf32>
    %127 = arith.divf %125, %126 : vector<8x128xf32>
    %128 = vector.extract_strided_slice %109 {offsets = [0, 256], sizes = [8, 128], strides = [1, 1]} : vector<8x384xf32> to vector<8x128xf32>
    %129 = vector.extract_strided_slice %111 {offsets = [0, 256], sizes = [8, 128], strides = [1, 1]} : vector<8x384xf32> to vector<8x128xf32>
    %130 = arith.mulf %119, %129 : vector<8x128xf32>
    %131 = arith.addf %128, %130 : vector<8x128xf32>
    %132 = math.tanh %131 : vector<8x128xf32>
    %cst_35 = arith.constant 1.000000e+00 : f32
    %133 = vector.broadcast %cst_35 : f32 to vector<8x128xf32>
    %134 = arith.subf %133, %127 : vector<8x128xf32>
    %135 = arith.mulf %134, %132 : vector<8x128xf32>
    %136 = arith.mulf %127, %105 : vector<8x128xf32>
    %137 = arith.addf %135, %136 : vector<8x128xf32>
    %c4_i32 = arith.constant 4 : i32
    %c0_36 = arith.constant 0 : index
    %c0_37 = arith.constant 0 : index
    %138 = vector.load %arg8[%c0_36, %c0_37] : memref<8x128xf32, #tpu.memory_space<vmem>>, vector<8x128xf32>
    tpu.vector_store %arg8[%c0_36, %c0_37], %137 {strides = array<i32>} : memref<8x128xf32, #tpu.memory_space<vmem>>, vector<8x128xf32>,
    %c1_i32_38 = arith.constant 1 : i32
    %139 = arith.cmpi eq, %arg1, %c1_i32_38 : i32
    %140 = arith.extui %139 : i1 to i32
    %c0_i32_39 = arith.constant 0 : i32
    %141 = arith.cmpi ne, %140, %c0_i32_39 : i32
    scf.if %141 {
      %142 = arith.truncf %137 : vector<8x128xf32> to vector<8x128xbf16>
      %c0_40 = arith.constant 0 : index
      %c0_41 = arith.constant 0 : index
      %143 = vector.load %arg5[%c0_40, %c0_41] : memref<128x128xbf16, #tpu.memory_space<vmem>>, vector<128x128xbf16>
      %cst_42 = arith.constant dense<0.000000e+00> : vector<8x128xf32>
      %144 = tpu.matmul %142, %143, %cst_42 {dimension_numbers = #tpu.dot_dimension_numbers<[1], [0], [0], [1], [0, 0, 1, 1], [], []>} : vector<8x128xbf16>, vector<128x128xbf16>, vector<8x128xf32> -> vector<8x128xf32>
      %c0_43 = arith.constant 0 : index
      %c0_44 = arith.constant 0 : index
      %145 = vector.load %arg6[%c0_43, %c0_44] : memref<1x128xf32, #tpu.memory_space<vmem>>, vector<1x128xf32>
      %146 = vector.broadcast %145 : vector<1x128xf32> to vector<8x128xf32>
      %147 = arith.addf %144, %146 : vector<8x128xf32>
      %148 = arith.truncf %147 : vector<8x128xf32> to vector<8x128xbf16>
      %c0_45 = arith.constant 0 : index
      %c0_46 = arith.constant 0 : index
      %149 = vector.load %arg7[%c0_45, %c0_46] : memref<8x128xbf16, #tpu.memory_space<vmem>>, vector<8x128xbf16>
      tpu.vector_store %arg7[%c0_45, %c0_46], %148 {strides = array<i32>} : memref<8x128xbf16, #tpu.memory_space<vmem>>, vector<8x128xbf16>,
    } else {
    }
    return
  }
  func.func @transform_0(%arg0: i32, %arg1: i32) -> (i32, i32, i32, i32) {
    %c0_i32 = arith.constant 0 : i32
    %c0_i32_0 = arith.constant 0 : i32
    %c0_i32_1 = arith.constant 0 : i32
    return %arg1, %arg0, %c0_i32, %c0_i32_0 : i32, i32, i32, i32
  }
  func.func @transform_1(%arg0: i32, %arg1: i32) -> (i32, i32) {
    %c0_i32 = arith.constant 0 : i32
    %c0_i32_0 = arith.constant 0 : i32
    %c0_i32_1 = arith.constant 0 : i32
    return %c0_i32, %c0_i32_0 : i32, i32
  }
  func.func @transform_2(%arg0: i32, %arg1: i32) -> (i32, i32) {
    %c0_i32 = arith.constant 0 : i32
    %c0_i32_0 = arith.constant 0 : i32
    %c0_i32_1 = arith.constant 0 : i32
    return %c0_i32, %c0_i32_0 : i32, i32
  }
  func.func @transform_3(%arg0: i32, %arg1: i32) -> (i32, i32) {
    %c0_i32 = arith.constant 0 : i32
    %c0_i32_0 = arith.constant 0 : i32
    %c0_i32_1 = arith.constant 0 : i32
    return %c0_i32, %c0_i32_0 : i32, i32
  }
  func.func @transform_4(%arg0: i32, %arg1: i32) -> (i32, i32) {
    %c0_i32 = arith.constant 0 : i32
    %c0_i32_0 = arith.constant 0 : i32
    %c0_i32_1 = arith.constant 0 : i32
    return %c0_i32, %c0_i32_0 : i32, i32
  }
  func.func @transform_5(%arg0: i32, %arg1: i32) -> (i32, i32) {
    %c0_i32 = arith.constant 0 : i32
    %c0_i32_0 = arith.constant 0 : i32
    return %arg0, %c0_i32 : i32, i32
  }
}

</mosaic_0001>

<bundles_post_ra>
// kernel: gru4rec_forward.3
= control target key start
LH: loop header
LB: loop body
LE: loop exit
PB: predicated region body
PF: predicated region fallthrough
CT: control target
= control target key end

     0   :  { %v231_v1 = vmov 0.0   ;;  %vm232_vm0 = vmmov 0   ;;  %s298_s0 = inlined_call_operand.vmem [shape: bf16[16,128], index: 0, kind: input, shape index: {}]   ;;  %s299_s1 = inlined_call_operand.vmem [shape: bf16[128,128], index: 1, kind: input, shape index: {}]   ;;  %s300_s2 = inlined_call_operand.vmem [shape: f32[1,128], index: 2, kind: input, shape index: {}]   ;;  %s301_s3 = inlined_call_operand.hbm [shape: f32[16,128], index: 3, kind: output, shape index: {}]  }
   0x1   :  { %v198_v0 = vld [vmem:[%s299_s1] sm:$0xff]   ;;  %173 = vmatprep.subr.bf16.mxu0 %v231_v1  ;;  %v199_v2 = vld [vmem:[%s299_s1 + $0x8] sm:$0xff]   ;;  %189 = vmatprep.mubr.msk.bf16.mxu0 %vm232_vm0, %v231_v1  ;;  %v200_v3 = vld [vmem:[%s299_s1 + $0x10] sm:$0xff]  }
   0x2   :  { %174 = vmatpush3.bf16.msra.mxu0 %v198_v0 }
   0x3   :  { %175 = vmatprep.subr.bf16.mxu0 %v231_v1 }
   0x6   :  { %176 = vmatpush3.bf16.msra.mxu0 %v199_v2 }
   0x7   :  { %177 = vmatprep.subr.bf16.mxu0 %v231_v1 }
   0x8   :  { %8 = vsyncpa [#allocation3], 0  ;;  %v201_v4 = vld [vmem:[%s299_s1 + $0x18] sm:$0xff]   ;;  %v202_v5 = vld [vmem:[%s299_s1 + $0x20] sm:$0xff]   ;;  %s233_s5 = smov [#allocation2]  }
   0x9   :  { %v203_v6 = vld [vmem:[%s299_s1 + $0x28] sm:$0xff]   ;;  %v204_v7 = vld [vmem:[%s299_s1 + $0x30] sm:$0xff]   ;;  %v205_v8 = vld [vmem:[%s299_s1 + $0x38] sm:$0xff]   ;;  %s143_s6 = sshll.u32 %s233_s5, 4  ;;  %s144_s6 = int_to_ptr.vmem [resolvable:$true] %s143_s6 }
   0xa   :  { %178 = vmatpush3.bf16.msra.mxu0 %v200_v3  ;;  %v206_v9 = vld [vmem:[%s298_s0] sm:$0xff]   ;;  %s207_s1 = scalar_lea.vmem %s144_s6, 256  ;;  %p212_p1 = scmp.lt.s32.totalorder %s144_s6, %s144_s6 }
   0xb   :  { %179 = vmatprep.subr.bf16.mxu0 %v231_v1  ;;  %v154_v10 = vld [vmem:[%s300_s2] ss:$0 sm:$0xff]  ;;  %p208_p0 = scmp.ne.s32.totalorder %s144_s6, %s207_s1  ;;  %p213_p2 = scmp.lt.s32.totalorder %s207_s1, %s207_s1 }
   0xd   :  { %p214_p3 = por %p213_p2, %p212_p1 }
   0xe   :  { %180 = vmatpush3.bf16.msra.mxu0 %v201_v4 }
   0xf   :  { %181 = vmatprep.subr.bf16.mxu0 %v231_v1  ;;  %p215_p4 = pnand %p214_p3, %p208_p0 }
  0x12   :  { %182 = vmatpush3.bf16.msra.mxu0 %v202_v5 }
  0x13   :  { %183 = vmatprep.subr.bf16.mxu0 %v231_v1 }
  0x16   :  { %184 = vmatpush3.bf16.msra.mxu0 %v203_v6 }
  0x17   :  { %185 = vmatprep.subr.bf16.mxu0 %v231_v1 }
  0x1a   :  { %186 = vmatpush3.bf16.msra.mxu0 %v204_v7 }
  0x1b   :  { %187 = vmatprep.subr.bf16.mxu0 %v231_v1 }
  0x1e   :  { %188 = vmatpush3.bf16.msra.mxu0 %v205_v8 }
  0x21   :  { %190 = vmatmul.mubr.bf16.vlgmr.msra.gmra.mrb[0].mxu0 %v206_v9 }
  0xf4   :  { %v129_v11 = vpop.f32.mrb[0].mxu0 }
  0xf5   :  { %v130_v12 = vadd.f32 %v154_v10, %v129_v11  ;;  %v191_v13 = vpop.f32.mrb[1].mxu0 }
  0xf6   :  { %v132_v14 = vpop.f32.mrb[2].mxu0 }
  0xf7   :  { %136 = vst [vmem:[#allocation2] sm:$0xff] %v130_v12  ;;  %v133_v15 = vadd.f32 %v154_v10, %v132_v14  ;;  %v192_v16 = vpop.f32.mrb[3].mxu0 }
  0xf9   :  { %137 = vst [vmem:[#allocation2 + $0x8] sm:$0xff] %v133_v15 }
  0xfa   :  { %218 = shalt.err (!%p215_p4)
}
  0xfb   :  { %s219_s7 = scalar_lea.hbm %s301_s3, 256 }
  0xfc   :  { %p220_p5 = scmp.ne.s32.totalorder %s301_s3, %s219_s7  ;;  %p223_p6 = scmp.lt.u32.totalorder %s219_s7, %s301_s3 }
  0xfe   :  { %p225_p7 = pnand %p223_p6, %p220_p5 }
 0x100   :  { %228 = shalt.err (!%p225_p7)
}
 0x101   :  { %s234_s12 = smov 128   ;;  %s235_s13 = smov 8  }
 0x102   :  { %149 = dma.vmem_to_hbm [thread:$0]  %s144_s6, 256, %s301_s3, [#allocation3], %s234_s12, %s234_s12, %s235_s13  }
 0x103   :  { %229 = dma.done.wait [#allocation3], 256  }
 0x104   :  { %230 = vsyncadd [#allocation3], 4294967040 }
 0x105   :  { %153 = vsyncpa [#allocation3], 1 }

// kernel: gru4rec_forward.2
= control target key start
LH: loop header
LB: loop body
LE: loop exit
PB: predicated region body
PF: predicated region fallthrough
CT: control target
= control target key end

     0   :  { %s1828_s18 = smov 0   ;;  %s1830_s19 = smov 0   ;;  %s2295_s0 = inlined_call_operand.vmem [shape: bf16[2,2,32,128], index: 0, kind: input, shape index: {}]   ;;  %s2296_s1 = inlined_call_operand.vmem [shape: bf16[128,384], index: 1, kind: input, shape index: {}]   ;;  %s2297_s2 = inlined_call_operand.vmem [shape: bf16[128,384], index: 2, kind: input, shape index: {}]   ;;  %s2298_s3 = inlined_call_operand.vmem [shape: bf16[128,128], index: 3, kind: input, shape index: {}]   ;;  %s2299_s4 = inlined_call_operand.vmem [shape: f32[1,128], index: 4, kind: input, shape index: {}]   ;;  %s2300_s5 = inlined_call_operand.vmem [shape: bf16[16,128], index: 5, kind: output, shape index: {}]  }
   0x1   :  { %s1832_s20 = smov 0   ;;  %s1834_s21 = smov 0  }
   0x2   :  { %s1836_s22 = smov 0  }
   0x3 LB: > { %s24_s23 = sadd.s32 1, %s1782_s20  ;;  %s27_s24 = sadd.s32 1, %s1786_s21  ;;  %s1790_s22 = sphi %s1836_s22, %s15_s22   ;;  %s1786_s21 = sphi %s1834_s21, %s2304_s21   ;;  %s1782_s20 = sphi %s1832_s20, %s2303_s20   ;;  %s1778_s19 = sphi %s1830_s19, %s2302_s19   ;;  %s1774_s18 = sphi %s1828_s18, %s2301_s18  }
   0x4   : > { %p25_p0 = scmp.ge.s32.totalorder %s24_s23, 2  ;;  %p1341_p1 = scmp.ge.s32.totalorder %s1790_s22, 1 }
   0x5   : > { %p205_p2 = scmp.lt.s32.totalorder %s1790_s22, 5 }
   0x6   : > { %s2306_s23 = smov (%p25_p0, %s24_s23), 0  ;;  %s2308_s24 = smov (!%p25_p0, %s27_s24), %s1786_s21 }
   0x7   : > { %p206_p3 = pnand %p1341_p1, %p205_p2  ;;  %p29_p4 = scmp.ge.s32.totalorder %s2308_s24, 2 }
   0x8   : > { %p236_p5 = scmp.lt.s32.totalorder (!%p206_p3), %s1774_s18, 1  ;;  %p238_p6 = scmp.lt.s32.totalorder (!%p206_p3), %s1778_s19, 1 }
   0x9   : > { %s2310_s24 = smov (%p29_p4, %s2308_s24), 0  ;;  %209 = sbr.rel (%p206_p3) target bundleno = 1359 (0x54f), region = 40 }
   0xa   : > { %p1346_p7 = scmp.ne.s32.totalorder (!%p206_p3), %s1774_s18, 0 }
  0x10   : > { %s237_s25 = scalar_select %p236_p5, %s1774_s18, 1 }
  0x11   : > { %s2312_s19 = smov (!%p238_p6, %s1778_s19), 1  ;;  %253 = sbr.rel (%p1346_p7) target bundleno = 24 (0x18), region = 44 }
  0x12   : > { %s1343_s26 = sshll.u32 %s237_s25, 3  ;;  %s1342_s27 = sshll.u32 %s2312_s19, 2  ;;  %v1792_v0 = vmov (!%p1346_p7), 0.0  }
  0x13   : > { %s242_s28 = sadd.s32 %s1343_s26, %s1342_s27  ;;  %s1865_s6 = scalar_lea.vmem %s2300_s5, %s1342_s27  ;;  %254 = vst [vmem:[#allocation2] sm:$0xff] (!%p1346_p7), %v1792_v0 }
  0x14   : > { %s1344_s7 = sshll.u32 %s242_s28, 2 }
  0x15   : > { %s1870_s10 = scalar_lea.vmem %s2295_s0, %s1344_s7 }
  0x18 PF: > { %v1638_v1 = vld [vmem:[%s2296_s1 + $0x4] ss:$12 sps:$4 sm:$0xff]   ;;  %v1640_v2 = vld [vmem:[%s2296_s1] ss:$12 sps:$4 sm:$0xff]   ;;  %v1793_v3 = vmov 0   ;;  %v1794_v36 = vmov 0.0  }
  0x19   : > { %463 = vmatprep.mubr.bf16.mxu0 %v1793_v3  ;;  %431 = vmatprep.subr.bf16.mxu0 %v1638_v1  ;;  %v1641_v4 = vld [vmem:[%s2296_s1 + $0x1c] ss:$12 sps:$4 sm:$0xff]   ;;  %v1643_v5 = vld [vmem:[%s2296_s1 + $0x18] ss:$12 sps:$4 sm:$0xff]   ;;  %v1644_v6 = vld [vmem:[%s2296_s1 + $0x34] ss:$12 sps:$4 sm:$0xff]  }
  0x1a   : > { %432 = vmatpush1.bf16.msra.mxu0 %v1640_v2  ;;  %v1646_v7 = vld [vmem:[%s2296_s1 + $0x30] ss:$12 sps:$4 sm:$0xff]   ;;  %v1647_v8 = vld [vmem:[%s2296_s1 + $0x4c] ss:$12 sps:$4 sm:$0xff]   ;;  %v1659_v9 = vld [vmem:[%s2296_s1 + $0x8] ss:$12 sps:$4 sm:$0xff]  }
  0x1b   : > { %433 = vmatprep.subr.bf16.mxu0 %v1641_v4  ;;  %v1649_v10 = vld [vmem:[%s2296_s1 + $0x48] ss:$12 sps:$4 sm:$0xff]   ;;  %v1650_v11 = vld [vmem:[%s2296_s1 + $0x64] ss:$12 sps:$4 sm:$0xff]   ;;  %1472 = vmatprep.subr.bf16.mxu1 %v1659_v9  ;;  %v1663_v12 = vld [vmem:[%s2296_s1 + $0x20] ss:$12 sps:$4 sm:$0xff]  }
  0x1c   : > { %1473 = vmatpush3.bf16.msra.mxu1 %v1659_v9  ;;  %v1664_v13 = vld [vmem:[%s1870_s10] sm:$0xff]   ;;  %v1653_v16 = vld [vmem:[%s2296_s1 + $0x7c] ss:$12 sps:$4 sm:$0xff]   ;;  %v1660_v22 = vld [vmem:[%s2296_s1 + $0xac] ss:$12 sps:$4 sm:$0xff]   ;;  %vm1795_vm0 = vmmov 0  }
  0x1d   : > { %1474 = vmatprep.subr.bf16.mxu1 %v1663_v12  ;;  %v1652_v14 = vld [vmem:[%s2296_s1 + $0x60] ss:$12 sps:$4 sm:$0xff]   ;;  %v1667_v15 = vld [vmem:[%s2296_s1 + $0x38] ss:$12 sps:$4 sm:$0xff]   ;;  %1488 = vmatprep.mubr.bf16.mxu1 %v1664_v13  ;;  %v1671_v17 = vld [vmem:[%s2296_s1 + $0x50] ss:$12 sps:$4 sm:$0xff]  }
  0x1e   : > { %434 = vmatpush1.bf16.msra.mxu0 %v1643_v5  ;;  %v1655_v18 = vld [vmem:[%s2296_s1 + $0x78] ss:$12 sps:$4 sm:$0xff]   ;;  %v1656_v19 = vld [vmem:[%s2296_s1 + $0x94] ss:$12 sps:$4 sm:$0xff]   ;;  %v1658_v21 = vld [vmem:[%s2296_s1 + $0x90] ss:$12 sps:$4 sm:$0xff]  }
  0x1f   : > { %435 = vmatprep.subr.bf16.mxu0 %v1644_v6  ;;  %v1675_v20 = vld [vmem:[%s2296_s1 + $0x68] ss:$12 sps:$4 sm:$0xff]   ;;  %v1679_v23 = vld [vmem:[%s2296_s1 + $0x80] ss:$12 sps:$4 sm:$0xff]   ;;  %v1944_v25 = vld [vmem:[%s2297_s2 + $0x4] ss:$12 sps:$4 sm:$0xff]  }
  0x20   : > { %1475 = vmatpush3.bf16.msra.mxu1 %v1663_v12  ;;  %v1662_v24 = vld [vmem:[%s2296_s1 + $0xa8] ss:$12 sps:$4 sm:$0xff]   ;;  %v1683_v26 = vld [vmem:[%s2296_s1 + $0x98] ss:$12 sps:$4 sm:$0xff]   ;;  %v1952_v27 = vld [vmem:[%s2297_s2] ss:$12 sps:$4 sm:$0xff]  }
  0x21   : > { %1476 = vmatprep.subr.bf16.mxu1 %v1667_v15  ;;  %v1958_v28 = vld [vmem:[%s2297_s2 + $0x1c] ss:$12 sps:$4 sm:$0xff]   ;;  %v1967_v30 = vld [vmem:[%s2297_s2 + $0x18] ss:$12 sps:$4 sm:$0xff]   ;;  %v1974_v31 = vld [vmem:[%s2297_s2 + $0x34] ss:$12 sps:$4 sm:$0xff]  }
  0x22   : > { %436 = vmatpush1.bf16.msra.mxu0 %v1646_v7  ;;  %v1688_v29 = vld [vmem:[%s2296_s1 + $0xb0] ss:$12 sps:$4 sm:$0xff]   ;;  %v1687_v32 = vld [vmem:[%s1870_s10 + $0x8] sm:$0xff]   ;;  %v2033_v42 = vld [vmem:[%s2297_s2 + $0x38] ss:$12 sps:$4 sm:$0xff]   ;;  %p1405_p8 = scmp.ne.s32.totalorder %s1774_s18, 1 }
  0x23   : > { %437 = vmatprep.subr.bf16.mxu0 %v1647_v8  ;;  %v1981_v33 = vld [vmem:[%s2297_s2 + $0x30] ss:$12 sps:$4 sm:$0xff]   ;;  %v1987_v34 = vld [vmem:[%s2297_s2 + $0x4c] ss:$12 sps:$4 sm:$0xff]   ;;  %v1992_v35 = vld [vmem:[%s2297_s2 + $0x8] ss:$12 sps:$4 sm:$0xff]  }
  0x24   : > { %1477 = vmatpush3.bf16.msra.mxu1 %v1667_v15  ;;  %v1999_v37 = vld [vmem:[%s2297_s2 + $0x48] ss:$12 sps:$4 sm:$0xff]   ;;  %v2006_v38 = vld [vmem:[%s2297_s2 + $0x64] ss:$12 sps:$4 sm:$0xff]   ;;  %v2012_v39 = vld [vmem:[%s2297_s2 + $0x20] ss:$12 sps:$4 sm:$0xff]  }
  0x25   : > { %1478 = vmatprep.subr.bf16.mxu1 %v1671_v17  ;;  %v2021_v40 = vld [vmem:[%s2297_s2 + $0x60] ss:$12 sps:$4 sm:$0xff]   ;;  %v2027_v41 = vld [vmem:[%s2297_s2 + $0x7c] ss:$12 sps:$4 sm:$0xff]   ;;  %v2040_v43 = vld [vmem:[%s2297_s2 + $0x78] ss:$12 sps:$4 sm:$0xff]  }
  0x26   : > { %438 = vmatpush1.bf16.msra.mxu0 %v1649_v10  ;;  %v2046_v44 = vld [vmem:[%s2297_s2 + $0x94] ss:$12 sps:$4 sm:$0xff]   ;;  %v2052_v45 = vld [vmem:[%s2297_s2 + $0x50] ss:$12 sps:$4 sm:$0xff]   ;;  %v2065_v47 = vld [vmem:[%s2297_s2 + $0xac] ss:$12 sps:$4 sm:$0xff]  }
  0x27   : > { %439 = vmatprep.subr.bf16.mxu0 %v1650_v11  ;;  %v2059_v46 = vld [vmem:[%s2297_s2 + $0x90] ss:$12 sps:$4 sm:$0xff]   ;;  %v2071_v48 = vld [vmem:[%s2297_s2 + $0x68] ss:$12 sps:$4 sm:$0xff]   ;;  %v2080_v50 = vld [vmem:[#allocation2] sm:$0xff]  ;;  %vm1797_vm1 = vmmov (!%p1405_p8), 0  }
  0x28   : > { %1479 = vmatpush3.bf16.msra.mxu1 %v1671_v17  ;;  %v2078_v49 = vld [vmem:[%s2297_s2 + $0xa8] ss:$12 sps:$4 sm:$0xff]   ;;  %v2087_v51 = vld [vmem:[%s2297_s2 + $0x80] ss:$12 sps:$4 sm:$0xff]   ;;  %v584_v52 = vpack.c.bf16 %v2080_v50, %v2080_v50  ;;  %v2098_v53 = vld [vmem:[%s2297_s2 + $0x98] ss:$12 sps:$4 sm:$0xff]  }
  0x29   : > { %1480 = vmatprep.subr.bf16.mxu1 %v1675_v20  ;;  %v2108_v54 = vld [vmem:[%s2297_s2 + $0xb0] ss:$12 sps:$4 sm:$0xff]  }
  0x2a   : > { %440 = vmatpush1.bf16.msra.mxu0 %v1652_v14 }
  0x2b   : > { %441 = vmatprep.subr.bf16.mxu0 %v1653_v16 }
  0x2c   : > { %1481 = vmatpush3.bf16.msra.mxu1 %v1675_v20 }
  0x2d   : > { %1482 = vmatprep.subr.bf16.mxu1 %v1679_v23 }
  0x2e   : > { %442 = vmatpush1.bf16.msra.mxu0 %v1655_v18 }
  0x2f   : > { %443 = vmatprep.subr.bf16.mxu0 %v1656_v19 }
  0x30   : > { %1483 = vmatpush3.bf16.msra.mxu1 %v1679_v23 }
  0x31   : > { %1484 = vmatprep.subr.bf16.mxu1 %v1683_v26 }
  0x32   : > { %444 = vmatpush1.bf16.msra.mxu0 %v1658_v21 }
  0x33   : > { %445 = vmatprep.subr.bf16.mxu0 %v1660_v22 }
  0x34   : > { %1485 = vmatpush3.bf16.msra.mxu1 %v1683_v26 }
  0x35   : > { %1486 = vmatprep.subr.bf16.mxu1 %v1688_v29 }
  0x36   : > { %446 = vmatpush1.bf16.msra.mxu0 %v1662_v24 }
  0x37   : > { %713 = vmatprep.subr.bf16.mxu0 %v1944_v25 }
  0x38   : > { %1487 = vmatpush3.bf16.msra.mxu1 %v1688_v29 }
  0x39   : > { %464 = vmatmul.mubr.bf16.vlgmr.msra.gmra.mrb[0].mxu0 %v1664_v13  ;;  %1492 = vmatprep.subr.bf16.mxu1 %v1794_v36 }
  0x3a   : > { %714 = vmatpush1.bf16.msra.mxu0 %v1952_v27  ;;  %473 = vmatprep.mubr.bf16.mxu0 %v1793_v3 }
  0x3b   : > { %715 = vmatprep.subr.bf16.mxu0 %v1958_v28  ;;  %1489 = vmatmul.mubr.bf16.vlgmr.msra.gmra.mrb[0].mxu1 %v1687_v32 }
  0x3c   : > { %1493 = vmatpush3.bf16.msra.mxu1 %v1992_v35  ;;  %1508 = vmatprep.mubr.msk.bf16.mxu1 %vm1795_vm0, %v1794_v36 }
  0x3d   : > { %1494 = vmatprep.subr.bf16.mxu1 %v1794_v36 }
  0x3e   : > { %716 = vmatpush1.bf16.msra.mxu0 %v1967_v30 }
  0x3f   : > { %717 = vmatprep.subr.bf16.mxu0 %v1974_v31 }
  0x40   : > { %1495 = vmatpush3.bf16.msra.mxu1 %v2012_v39 }
  0x41   : > { %474 = vmatmul.mubr.bf16.gmra.mrb[4].mxu0 %v1687_v32  ;;  %1496 = vmatprep.subr.bf16.mxu1 %v1794_v36 }
  0x42   : > { %718 = vmatpush1.bf16.msra.mxu0 %v1981_v33  ;;  %745 = vmatprep.mubr.bf16.mxu0 %v1793_v3 }
  0x43   : > { %719 = vmatprep.subr.bf16.mxu0 %v1987_v34 }
  0x44   : > { %1497 = vmatpush3.bf16.msra.mxu1 %v2033_v42 }
  0x45   : > { %1498 = vmatprep.subr.bf16.mxu1 %v1794_v36 }
  0x46   : > { %720 = vmatpush1.bf16.msra.mxu0 %v1999_v37 }
  0x47   : > { %721 = vmatprep.subr.bf16.mxu0 %v2006_v38 }
  0x48   : > { %1499 = vmatpush3.bf16.msra.mxu1 %v2052_v45 }
  0x49   : > { %1500 = vmatprep.subr.bf16.mxu1 %v1794_v36 }
  0x4a   : > { %722 = vmatpush1.bf16.msra.mxu0 %v2021_v40 }
  0x4b   : > { %723 = vmatprep.subr.bf16.mxu0 %v2027_v41 }
  0x4c   : > { %1501 = vmatpush3.bf16.msra.mxu1 %v2071_v48 }
  0x4d   : > { %1502 = vmatprep.subr.bf16.mxu1 %v1794_v36 }
  0x4e   : > { %724 = vmatpush1.bf16.msra.mxu0 %v2040_v43 }
  0x4f   : > { %725 = vmatprep.subr.bf16.mxu0 %v2046_v44 }
  0x50   : > { %1503 = vmatpush3.bf16.msra.mxu1 %v2087_v51 }
  0x51   : > { %1504 = vmatprep.subr.bf16.mxu1 %v1794_v36 }
  0x52   : > { %726 = vmatpush1.bf16.msra.mxu0 %v2059_v46 }
  0x53   : > { %727 = vmatprep.subr.bf16.mxu0 %v2065_v47 }
  0x54   : > { %1505 = vmatpush3.bf16.msra.mxu1 %v2098_v53 }
  0x55   : > { %1506 = vmatprep.subr.bf16.mxu1 %v1794_v36 }
  0x56   : > { %728 = vmatpush1.bf16.msra.mxu0 %v2078_v49 }
  0x57   : > { %822 = vmatprep.subr.bf16.mxu0 %v1944_v25 }
  0x58   : > { %1507 = vmatpush3.bf16.msra.mxu1 %v2108_v54 }
  0x59   : > { %746 = vmatmul.mubr.bf16.vlgmr.msra.gmra.mrb[8].mxu0 %v584_v52  ;;  %1512 = vmatprep.subr.bf16.mxu1 %v1794_v36 }
  0x5a   : > { %823 = vmatpush1.bf16.msra.mxu0 %v1952_v27  ;;  %854 = vmatprep.mubr.bf16.mxu0 %v1793_v3 }
  0x5b   : > { %824 = vmatprep.subr.bf16.mxu0 %v1958_v28  ;;  %1509 = vmatmul.mubr.bf16.vlgmr.msra.gmra.mrb[4].mxu1 %v584_v52 }
  0x5c   : > { %1513 = vmatpush3.bf16.msra.mxu1 %v1992_v35  ;;  %1528 = vmatprep.mubr.msk.bf16.mxu1 %vm1795_vm0, %v1794_v36 }
  0x5d   : > { %1514 = vmatprep.subr.bf16.mxu1 %v1794_v36 }
  0x5e   : > { %825 = vmatpush1.bf16.msra.mxu0 %v1967_v30 }
  0x5f   : > { %826 = vmatprep.subr.bf16.mxu0 %v1974_v31 }
  0x60   : > { %1515 = vmatpush3.bf16.msra.mxu1 %v2012_v39 }
  0x61   : > { %1516 = vmatprep.subr.bf16.mxu1 %v1794_v36 }
  0x62   : > { %827 = vmatpush1.bf16.msra.mxu0 %v1981_v33 }
  0x63   : > { %828 = vmatprep.subr.bf16.mxu0 %v1987_v34 }
  0x64   : > { %1517 = vmatpush3.bf16.msra.mxu1 %v2033_v42 }
  0x65   : > { %1518 = vmatprep.subr.bf16.mxu1 %v1794_v36 }
  0x66   : > { %829 = vmatpush1.bf16.msra.mxu0 %v1999_v37 }
  0x67   : > { %830 = vmatprep.subr.bf16.mxu0 %v2006_v38 }
  0x68   : > { %1519 = vmatpush3.bf16.msra.mxu1 %v2052_v45 }
  0x69   : > { %1520 = vmatprep.subr.bf16.mxu1 %v1794_v36 }
  0x6a   : > { %831 = vmatpush1.bf16.msra.mxu0 %v2021_v40 }
  0x6b   : > { %832 = vmatprep.subr.bf16.mxu0 %v2027_v41 }
  0x6c   : > { %1521 = vmatpush3.bf16.msra.mxu1 %v2071_v48 }
  0x6d   : > { %1522 = vmatprep.subr.bf16.mxu1 %v1794_v36 }
  0x6e   : > { %833 = vmatpush1.bf16.msra.mxu0 %v2040_v43 }
  0x6f   : > { %834 = vmatprep.subr.bf16.mxu0 %v2046_v44 }
  0x70   : > { %1523 = vmatpush3.bf16.msra.mxu1 %v2087_v51 }
  0x71   : > { %1524 = vmatprep.subr.bf16.mxu1 %v1794_v36 }
  0x72   : > { %835 = vmatpush1.bf16.msra.mxu0 %v2059_v46 }
  0x73   : > { %836 = vmatprep.subr.bf16.mxu0 %v2065_v47 }
  0x74   : > { %1525 = vmatpush3.bf16.msra.mxu1 %v2098_v53 }
  0x75   : > { %1526 = vmatprep.subr.bf16.mxu1 %v1794_v36 }
  0x76   : > { %837 = vmatpush1.bf16.msra.mxu0 %v2078_v49 }
  0x77   : > { %931 = vmatprep.subr.bf16.mxu0 %v1944_v25 }
  0x78   : > { %1527 = vmatpush3.bf16.msra.mxu1 %v2108_v54 }
  0x79   : > { %1532 = vmatprep.subr.bf16.mxu1 %v1794_v36 }
 0x10c   : > { %v465_v55 = vpop.f32.mrb[0].mxu0 }
 0x10d   : > { %v467_v56 = vpop.f32.mrb[1].mxu0 }
 0x10e   : > { %v2145_v57 = vpop.f32.mrb[2].mxu0  ;;  %v2155_v62 = vpop.f32.mrb[0].mxu1 }
 0x10f   : > { %v2147_v58 = vpop.f32.mrb[3].mxu0  ;;  %v518_v0 = vpop.f32.mrb[1].mxu1 }
 0x110   : > { %v2159_v1 = vpop.f32.mrb[2].mxu1 }
 0x111   : > { %v2161_v2 = vpop.f32.mrb[3].mxu1 }
 0x114   : > { %v2149_v59 = vpop.f32.mrb[4].mxu0 }
 0x115   : > { %v2151_v60 = vpop.f32.mrb[5].mxu0 }
 0x116   : > { %v2153_v61 = vpop.f32.mrb[6].mxu0 }
 0x117   : > { %v2157_v63 = vpop.f32.mrb[7].mxu0 }
 0x12c   : > { %v747_v4 = vpop.f32.mrb[8].mxu0 }
 0x12d   : > { %v794_v5 = vadd.f32 %v747_v4, %v465_v55  ;;  %v749_v6 = vpop.f32.mrb[9].mxu0 }
 0x12e   : > { %v801_v7 = vadd.f32 %v749_v6, %v467_v56  ;;  %v751_v8 = vpop.f32.mrb[10].mxu0  ;;  %v788_v12 = vpop.f32.mrb[4].mxu1 }
 0x12f   : > { %v1397_v9 = vmul.f32 -1.442695, %v794_v5  ;;  %v752_v10 = vpop.f32.mrb[11].mxu0  ;;  %v1510_v13 = vpop.f32.mrb[5].mxu1 }
 0x130   : > { %v1398_v11 = vmul.f32 -1.442695, %v801_v7  ;;  %v791_v14 = vpop.f32.mrb[6].mxu1 }
 0x131   : > { %1704 = vpow2.f32 %v1397_v9  ;;  %v1511_v15 = vpop.f32.mrb[7].mxu1 }
 0x132   : > { %1706 = vpow2.f32 %v1398_v11 }
 0x13b   : > { %v1705_v16 = vpop.eup %1704 }
 0x13c   : > { %v798_v17 = vadd.f32 1.0, %v1705_v16  ;;  %v1707_v18 = vpop.eup %1706 }
 0x13d   : > { %v805_v19 = vadd.f32 1.0, %v1707_v18 }
 0x13e   : > { %1708 = vrcp.f32 %v798_v17 }
 0x13f   : > { %1710 = vrcp.f32 %v805_v19 }
 0x148   : > { %v1709_v20 = vpop.eup %1708 }
 0x149   : > { %v808_v21 = vmul.f32 %v1709_v20, %v788_v12  ;;  %v1711_v23 = vpop.eup %1710 }
 0x14a   : > { %v811_v24 = vsub.f32 1.0, %v1711_v23  ;;  %v813_v32 = vmul.f32 %v1711_v23, %v2080_v50 }
 0x14b   : > { %v809_v22 = vadd.f32 %v808_v21, %v518_v0 }
 0x14d   : > { %1712 = vtanh.f32 %v809_v22 }
 0x157   : > { %v1713_v26 = vpop.eup %1712 }
 0x158   : > { %v812_v29 = vmul.f32 %v1713_v26, %v811_v24 }
 0x15a   : > { %v2164_v52 = vadd.f32 %v813_v32, %v812_v29 }
 0x15c   : > { %v821_v55 = vpack.c.bf16 %v2164_v52, %v2164_v52 }
 0x15e   : > { %855 = vmatmul.mubr.bf16.vlgmr.msra.gmra.mrb[12].mxu0 %v821_v55  ;;  %1529 = vmatmul.mubr.bf16.vlgmr.msra.gmra.mrb[8].mxu1 %v821_v55 }
 0x15f   : > { %932 = vmatpush1.bf16.msra.mxu0 %v1952_v27  ;;  %1533 = vmatpush3.bf16.msra.mxu1 %v1992_v35 }
 0x160   : > { %933 = vmatprep.subr.bf16.mxu0 %v1958_v28  ;;  %1534 = vmatprep.subr.bf16.mxu1 %v1794_v36 }
 0x161   : > { %963 = vmatprep.mubr.bf16.mxu0 %v1793_v3  ;;  %1548 = vmatprep.mubr.msk.bf16.mxu1 %vm1795_vm0, %v1794_v36 }
 0x163   : > { %934 = vmatpush1.bf16.msra.mxu0 %v1967_v30  ;;  %1535 = vmatpush3.bf16.msra.mxu1 %v2012_v39 }
 0x164   : > { %935 = vmatprep.subr.bf16.mxu0 %v1974_v31  ;;  %1536 = vmatprep.subr.bf16.mxu1 %v1794_v36 }
 0x167   : > { %936 = vmatpush1.bf16.msra.mxu0 %v1981_v33  ;;  %1537 = vmatpush3.bf16.msra.mxu1 %v2033_v42 }
 0x168   : > { %937 = vmatprep.subr.bf16.mxu0 %v1987_v34  ;;  %1538 = vmatprep.subr.bf16.mxu1 %v1794_v36 }
 0x16b   : > { %938 = vmatpush1.bf16.msra.mxu0 %v1999_v37  ;;  %1539 = vmatpush3.bf16.msra.mxu1 %v2052_v45 }
 0x16c   : > { %939 = vmatprep.subr.bf16.mxu0 %v2006_v38  ;;  %1540 = vmatprep.subr.bf16.mxu1 %v1794_v36 }
 0x16f   : > { %940 = vmatpush1.bf16.msra.mxu0 %v2021_v40  ;;  %1541 = vmatpush3.bf16.msra.mxu1 %v2071_v48 }
 0x170   : > { %941 = vmatprep.subr.bf16.mxu0 %v2027_v41  ;;  %1542 = vmatprep.subr.bf16.mxu1 %v1794_v36 }
 0x173   : > { %942 = vmatpush1.bf16.msra.mxu0 %v2040_v43  ;;  %1543 = vmatpush3.bf16.msra.mxu1 %v2087_v51 }
 0x174   : > { %943 = vmatprep.subr.bf16.mxu0 %v2046_v44  ;;  %1544 = vmatprep.subr.bf16.mxu1 %v1794_v36 }
 0x177   : > { %944 = vmatpush1.bf16.msra.mxu0 %v2059_v46  ;;  %1545 = vmatpush3.bf16.msra.mxu1 %v2098_v53 }
 0x178   : > { %945 = vmatprep.subr.bf16.mxu0 %v2065_v47  ;;  %1546 = vmatprep.subr.bf16.mxu1 %v1794_v36 }
 0x17b   : > { %946 = vmatpush1.bf16.msra.mxu0 %v2078_v49  ;;  %1547 = vmatpush3.bf16.msra.mxu1 %v2108_v54 }
 0x17c   : > { %1040 = vmatprep.subr.bf16.mxu0 %v1944_v25  ;;  %1552 = vmatprep.subr.bf16.mxu1 %v1794_v36 }
 0x231   : > { %v856_v50 = vpop.f32.mrb[12].mxu0  ;;  %v897_v56 = vpop.f32.mrb[8].mxu1 }
 0x232   : > { %v903_v0 = vadd.f32 %v856_v50, %v2145_v57  ;;  %v858_v4 = vpop.f32.mrb[13].mxu0  ;;  %v1530_v5 = vpop.f32.mrb[9].mxu1 }
 0x233   : > { %v910_v6 = vadd.f32 %v858_v4, %v2147_v58  ;;  %v860_v7 = vpop.f32.mrb[14].mxu0  ;;  %v900_v8 = vpop.f32.mrb[10].mxu1 }
 0x234   : > { %v1399_v9 = vmul.f32 -1.442695, %v903_v0  ;;  %v861_v10 = vpop.f32.mrb[15].mxu0  ;;  %v1531_v11 = vpop.f32.mrb[11].mxu1 }
 0x235   : > { %v1400_v12 = vmul.f32 -1.442695, %v910_v6 }
 0x236   : > { %1714 = vpow2.f32 %v1399_v9 }
 0x237   : > { %1716 = vpow2.f32 %v1400_v12 }
 0x240   : > { %v1715_v13 = vpop.eup %1714 }
 0x241   : > { %v907_v25 = vadd.f32 1.0, %v1715_v13  ;;  %v1717_v14 = vpop.eup %1716 }
 0x242   : > { %v914_v15 = vadd.f32 1.0, %v1717_v14  ;;  %v1744_v14 = vld [vmem:[%s2298_s3] sm:$0xff] (!%p1405_p8)  }
 0x243   : > { %1718 = vrcp.f32 %v907_v25 }
 0x244   : > { %1720 = vrcp.f32 %v914_v15  ;;  %v1796_v15 = vmov (!%p1405_p8), 0.0  }
 0x24d   : > { %v1719_v16 = vpop.eup %1718 }
 0x24e   : > { %v917_v17 = vmul.f32 %v1719_v16, %v897_v56  ;;  %v1721_v58 = vpop.eup %1720  ;;  %v1746_v16 = vld [vmem:[%s2298_s3 + $0x10] sm:$0xff] (!%p1405_p8)  }
 0x24f   : > { %v920_v18 = vsub.f32 1.0, %v1721_v58  ;;  %v922_v21 = vmul.f32 %v1721_v58, %v2164_v52  ;;  %v1749_v58 = vld [vmem:[%s2298_s3 + $0x28] sm:$0xff] (!%p1405_p8)  }
 0x250   : > { %v918_v57 = vadd.f32 %v917_v17, %v2161_v2  ;;  %v1747_v17 = vld [vmem:[%s2298_s3 + $0x18] sm:$0xff] (!%p1405_p8)  }
 0x252   : > { %1722 = vtanh.f32 %v918_v57  ;;  %v1748_v57 = vld [vmem:[%s2298_s3 + $0x20] sm:$0xff] (!%p1405_p8)  }
 0x25c   : > { %v1723_v19 = vpop.eup %1722 }
 0x25d   : > { %v921_v20 = vmul.f32 %v1723_v19, %v920_v18  ;;  %v1750_v18 = vld [vmem:[%s2298_s3 + $0x30] sm:$0xff] (!%p1405_p8)   ;;  %v1751_v19 = vld [vmem:[%s2298_s3 + $0x38] sm:$0xff] (!%p1405_p8)  }
 0x25f   : > { %v2207_v22 = vadd.f32 %v922_v21, %v921_v20  ;;  %v1406_v21 = vld [vmem:[%s2299_s4] ss:$0 sm:$0xff] (!%p1405_p8) }
 0x261   : > { %v930_v23 = vpack.c.bf16 %v2207_v22, %v2207_v22 }
 0x263   : > { %964 = vmatmul.mubr.bf16.vlgmr.msra.gmra.mrb[16].mxu0 %v930_v23  ;;  %1549 = vmatmul.mubr.bf16.vlgmr.msra.gmra.mrb[12].mxu1 %v930_v23 }
 0x264   : > { %1041 = vmatpush1.bf16.msra.mxu0 %v1952_v27  ;;  %1553 = vmatpush3.bf16.msra.mxu1 %v1992_v35 }
 0x265   : > { %1042 = vmatprep.subr.bf16.mxu0 %v1958_v28  ;;  %1554 = vmatprep.subr.bf16.mxu1 %v1794_v36 }
 0x266   : > { %1072 = vmatprep.mubr.bf16.mxu0 %v1793_v3  ;;  %1568 = vmatprep.mubr.msk.bf16.mxu1 %vm1795_vm0, %v1794_v36 }
 0x268   : > { %1043 = vmatpush1.bf16.msra.mxu0 %v1967_v30  ;;  %1555 = vmatpush3.bf16.msra.mxu1 %v2012_v39 }
 0x269   : > { %1044 = vmatprep.subr.bf16.mxu0 %v1974_v31  ;;  %1556 = vmatprep.subr.bf16.mxu1 %v1794_v36 }
 0x26c   : > { %1045 = vmatpush1.bf16.msra.mxu0 %v1981_v33  ;;  %1557 = vmatpush3.bf16.msra.mxu1 %v2033_v42 }
 0x26d   : > { %1046 = vmatprep.subr.bf16.mxu0 %v1987_v34  ;;  %1558 = vmatprep.subr.bf16.mxu1 %v1794_v36 }
 0x270   : > { %1047 = vmatpush1.bf16.msra.mxu0 %v1999_v37  ;;  %1559 = vmatpush3.bf16.msra.mxu1 %v2052_v45 }
 0x271   : > { %1048 = vmatprep.subr.bf16.mxu0 %v2006_v38  ;;  %1560 = vmatprep.subr.bf16.mxu1 %v1794_v36 }
 0x274   : > { %1049 = vmatpush1.bf16.msra.mxu0 %v2021_v40  ;;  %1561 = vmatpush3.bf16.msra.mxu1 %v2071_v48 }
 0x275   : > { %1050 = vmatprep.subr.bf16.mxu0 %v2027_v41  ;;  %1562 = vmatprep.subr.bf16.mxu1 %v1794_v36 }
 0x278   : > { %1051 = vmatpush1.bf16.msra.mxu0 %v2040_v43  ;;  %1563 = vmatpush3.bf16.msra.mxu1 %v2087_v51 }
 0x279   : > { %1052 = vmatprep.subr.bf16.mxu0 %v2046_v44  ;;  %1564 = vmatprep.subr.bf16.mxu1 %v1794_v36 }
 0x27c   : > { %1053 = vmatpush1.bf16.msra.mxu0 %v2059_v46  ;;  %1565 = vmatpush3.bf16.msra.mxu1 %v2098_v53 }
 0x27d   : > { %1054 = vmatprep.subr.bf16.mxu0 %v2065_v47  ;;  %1566 = vmatprep.subr.bf16.mxu1 %v1794_v36 }
 0x280   : > { %1055 = vmatpush1.bf16.msra.mxu0 %v2078_v49  ;;  %1567 = vmatpush3.bf16.msra.mxu1 %v2108_v54 }
 0x281   : > { %1572 = vmatprep.subr.bf16.mxu0 (!%p1405_p8), %v1796_v15 }
 0x336   : > { %v965_v3 = vpop.f32.mrb[16].mxu0  ;;  %v1006_v27 = vpop.f32.mrb[12].mxu1 }
 0x337   : > { %v1012_v28 = vadd.f32 %v965_v3, %v2149_v59  ;;  %v967_v30 = vpop.f32.mrb[17].mxu0  ;;  %v1550_v31 = vpop.f32.mrb[13].mxu1 }
 0x338   : > { %v1019_v33 = vadd.f32 %v967_v30, %v2151_v60  ;;  %v969_v34 = vpop.f32.mrb[18].mxu0  ;;  %v1009_v35 = vpop.f32.mrb[14].mxu1 }
 0x339   : > { %v1401_v37 = vmul.f32 -1.442695, %v1012_v28  ;;  %v970_v38 = vpop.f32.mrb[19].mxu0  ;;  %v1551_v39 = vpop.f32.mrb[15].mxu1 }
 0x33a   : > { %v1402_v40 = vmul.f32 -1.442695, %v1019_v33 }
 0x33b   : > { %1724 = vpow2.f32 %v1401_v37 }
 0x33c   : > { %1726 = vpow2.f32 %v1402_v40 }
 0x345   : > { %v1725_v36 = vpop.eup %1724 }
 0x346   : > { %v1016_v41 = vadd.f32 1.0, %v1725_v36  ;;  %v1727_v42 = vpop.eup %1726 }
 0x347   : > { %v1023_v43 = vadd.f32 1.0, %v1727_v42 }
 0x348   : > { %1728 = vrcp.f32 %v1016_v41 }
 0x349   : > { %1730 = vrcp.f32 %v1023_v43 }
 0x352   : > { %v1729_v44 = vpop.eup %1728 }
 0x353   : > { %v1026_v45 = vmul.f32 %v1729_v44, %v1006_v27  ;;  %v1731_v47 = vpop.eup %1730 }
 0x354   : > { %v1029_v48 = vsub.f32 1.0, %v1731_v47  ;;  %v1031_v53 = vmul.f32 %v1731_v47, %v2207_v22 }
 0x355   : > { %v1027_v46 = vadd.f32 %v2155_v62, %v1026_v45 }
 0x357   : > { %1732 = vtanh.f32 %v1027_v46 }
 0x361   : > { %v1733_v49 = vpop.eup %1732 }
 0x362   : > { %v1030_v51 = vmul.f32 %v1733_v49, %v1029_v48 }
 0x364   : > { %v1032_v54 = vadd.f32 %v1031_v53, %v1030_v51 }
 0x366   : > { %v1039_v59 = vpack.c.bf16 %v1032_v54, %v1032_v54 }
 0x368   : > { %1073 = vmatmul.mubr.bf16.vlgmr.msra.gmra.mrb[20].mxu0 %v1039_v59  ;;  %1569 = vmatmul.mubr.bf16.vlgmr.msra.gmra.mrb[16].mxu1 %v1039_v59 }
 0x369   : > { %1573 = vmatpush3.bf16.msra.mxu0 (!%p1405_p8), %v1744_v14  ;;  %1588 = vmatprep.mubr.msk.bf16.mxu0 (!%p1405_p8), %vm1797_vm1, %v1796_v15 }
 0x36a   : > { %1574 = vmatprep.subr.bf16.mxu0 (!%p1405_p8), %v1796_v15 }
 0x43b   : > { %v1074_v60 = vpop.f32.mrb[20].mxu0  ;;  %v1115_v2 = vpop.f32.mrb[16].mxu1 }
 0x43c   : > { %v1121_v24 = vadd.f32 %v1074_v60, %v2153_v61  ;;  %v1076_v26 = vpop.f32.mrb[21].mxu0  ;;  %v1570_v29 = vpop.f32.mrb[17].mxu1 }
 0x43d   : > { %v1128_v32 = vadd.f32 %v1076_v26, %v2157_v63  ;;  %v1078_v62 = vpop.f32.mrb[22].mxu0  ;;  %v1118_v52 = vpop.f32.mrb[18].mxu1 }
 0x43e   : > { %v1403_v55 = vmul.f32 -1.442695, %v1121_v24  ;;  %v1079_v50 = vpop.f32.mrb[23].mxu0  ;;  %v1571_v56 = vpop.f32.mrb[19].mxu1 }
 0x43f   : > { %v1404_v0 = vmul.f32 -1.442695, %v1128_v32 }
 0x440   : > { %1734 = vpow2.f32 %v1403_v55 }
 0x441   : > { %1736 = vpow2.f32 %v1404_v0 }
 0x44a   : > { %v1735_v4 = vpop.eup %1734 }
 0x44b   : > { %v1125_v5 = vadd.f32 1.0, %v1735_v4  ;;  %v1737_v6 = vpop.eup %1736 }
 0x44c   : > { %v1132_v7 = vadd.f32 1.0, %v1737_v6 }
 0x44d   : > { %1738 = vrcp.f32 %v1125_v5 }
 0x44e   : > { %1740 = vrcp.f32 %v1132_v7 }
 0x457   : > { %v1739_v8 = vpop.eup %1738 }
 0x458   : > { %v1135_v9 = vmul.f32 %v1739_v8, %v1115_v2  ;;  %v1741_v63 = vpop.eup %1740 }
 0x459   : > { %v1138_v10 = vsub.f32 1.0, %v1741_v63  ;;  %v1140_v13 = vmul.f32 %v1741_v63, %v1032_v54 }
 0x45a   : > { %v1136_v61 = vadd.f32 %v2159_v1, %v1135_v9  ;;  %v1745_v1 = vld [vmem:[%s2298_s3 + $0x8] sm:$0xff] (!%p1405_p8)  }
 0x45b   : > { %1575 = vmatpush3.bf16.msra.mxu0 (!%p1405_p8), %v1745_v1 }
 0x45c   : > { %1742 = vtanh.f32 %v1136_v61  ;;  %1576 = vmatprep.subr.bf16.mxu0 (!%p1405_p8), %v1796_v15 }
 0x45f   : > { %1577 = vmatpush3.bf16.msra.mxu0 (!%p1405_p8), %v1746_v16 }
 0x460   : > { %1578 = vmatprep.subr.bf16.mxu0 (!%p1405_p8), %v1796_v15 }
 0x463   : > { %1579 = vmatpush3.bf16.msra.mxu0 (!%p1405_p8), %v1747_v17 }
 0x464   : > { %1580 = vmatprep.subr.bf16.mxu0 (!%p1405_p8), %v1796_v15 }
 0x465   : > { %1146 = sbr.rel (%p1405_p8) target bundleno = 1359 (0x54f), region = 48 }
 0x466   : > { %v1743_v11 = vpop.eup %1742 }
 0x467   : > { %v1139_v12 = vmul.f32 %v1743_v11, %v1138_v10  ;;  %1581 = vmatpush3.bf16.msra.mxu0 (!%p1405_p8), %v1748_v57 }
 0x468   : > { %1582 = vmatprep.subr.bf16.mxu0 (!%p1405_p8), %v1796_v15 }
 0x469   : > { %v1141_v25 = vadd.f32 %v1140_v13, %v1139_v12 }
 0x46b   : > { %1142 = vst [vmem:[#allocation2] sm:$0xff] %v1141_v25  ;;  %1583 = vmatpush3.bf16.msra.mxu0 (!%p1405_p8), %v1749_v58  ;;  %v1147_v20 = vpack.c.bf16 (!%p1405_p8), %v1141_v25, %v1141_v25 }
 0x46c   : > { %1584 = vmatprep.subr.bf16.mxu0 %v1796_v15 }
 0x46f   : > { %1585 = vmatpush3.bf16.msra.mxu0 %v1750_v18 }
 0x470   : > { %1586 = vmatprep.subr.bf16.mxu0 %v1796_v15 }
 0x473   : > { %1587 = vmatpush3.bf16.msra.mxu0 %v1751_v19 }
 0x476   : > { %1589 = vmatmul.mubr.bf16.vlgmr.msra.gmra.mrb[0].mxu0 %v1147_v20 }
 0x549   : > { %v1253_v22 = vpop.f32.mrb[0].mxu0 }
 0x54a   : > { %v1254_v23 = vadd.f32 %v1406_v21, %v1253_v22  ;;  %v1590_v3 = vpop.f32.mrb[1].mxu0 }
 0x54b   : > { %v1256_v27 = vpop.f32.mrb[2].mxu0 }
 0x54c   : > { %v1259_v28 = vpack.c.bf16 %v1254_v23, %v1254_v23  ;;  %v1591_v30 = vpop.f32.mrb[3].mxu0 }
 0x54e   : > { %1260 = vst [vmem:[%s1865_s6] sm:$0xf] %v1259_v28 }
 0x54f PF: > { %s15_s22 = sadd.s32 1, %s1790_s22   ;;  %s2301_s18 = smov %s1782_s20 }
 0x550   : > { %p12_p9 = scmp.ge.s32.totalorder %s15_s22, 6   ;;  %s2302_s19 = smov %s1786_s21 }
 0x551   : > { %s2303_s20 = smov %s2306_s23  ;;  %s2304_s21 = smov %s2310_s24 }
 0x552   :  { %14 = sbr.rel (!%p12_p9) target bundleno = 3 (0x3), region = 82 }

</bundles_post_ra>
